<compile_context>
chip_gen: v5e
topology: v5e:2x2
jax: 0.10.0
libtpu: 0.0.40
codegen_flags: <defaults>
</compile_context>

<pallas_src>
import jax
import jax.numpy as jnp
from jax.experimental import pallas as pl
from jax.experimental.pallas import tpu as pltpu

VOCAB = 50          # original_embedding.num_embeddings
N_ENTITIES = 20     # lkg_embeddings.size(0)
D_TOK = 64          # original_embedding.embedding_dim
D_LKG = 32          # lkg_embeddings.size(1)
D_OUT = D_TOK       # nn.Linear(D_TOK + D_LKG, D_TOK)
BATCH = 2
SEQ_LEN = 8

VOCAB_PAD = 64      # next multiple of 8/tile-friendly contraction width
N_ENT_PAD = 32


def hybrid_embedding_kernel(tok_ids_ref, ent_ids_ref, fused_tok_ref,
                            fused_lkg_ref, out_ref):
    # tok_ids_ref / ent_ids_ref : (n, 1) int32  token / entity ids for this chunk
    # fused_tok_ref : (VOCAB_PAD, D_OUT) f32   = tok_table @ W[:D_TOK] + bias
    # fused_lkg_ref : (N_ENT_PAD, D_OUT) f32   = lkg_table @ W[D_TOK:]
    n = tok_ids_ref.shape[0]
    vocab_pad = fused_tok_ref.shape[0]
    n_ent_pad = fused_lkg_ref.shape[0]

    tok_ids = tok_ids_ref[...]                       # (n, 1)
    ent_ids = ent_ids_ref[...]                       # (n, 1)

    # In-kernel gather via one-hot matmuls at padded, tile-aligned widths
    # (MXU-friendly, unmasked feeds, always lowers).
    tok_oh = (jax.lax.broadcasted_iota(jnp.int32, (n, vocab_pad), 1) == tok_ids
              ).astype(jnp.float32)                  # (n, VOCAB_PAD)
    ent_oh = (jax.lax.broadcasted_iota(jnp.int32, (n, n_ent_pad), 1) == ent_ids
              ).astype(jnp.float32)                  # (n, N_ENT_PAD)

    # Two INDEPENDENT matmuls (Linear + bias already folded into the tables).
    out_ref[...] = (
        jnp.dot(tok_oh, fused_tok_ref[...], preferred_element_type=jnp.float32)
        + jnp.dot(ent_oh, fused_lkg_ref[...], preferred_element_type=jnp.float32)
    )


def hybrid_embedding_forward(input_ids, entity_ids, params, *, grid_blocks=1):
    """input_ids, entity_ids: (B, S) int32 -> (B, S, D_OUT) f32.

    grid_blocks=1 (default): whole batch in one grid step.  At this problem
    size keep grid_blocks=1 on ALL generations (v5e/v6e/v7x) -- the kernel is
    launch/DMA-latency bound and splitting across v7x's two TensorCores only
    pays once the per-core work is ~1-2K rows (then use 256-512-row chunks).
    """
    B, S = input_ids.shape
    N = B * S
    assert N % grid_blocks == 0
    chunk = N // grid_blocks
    assert grid_blocks == 1 or chunk % 8 == 0, "chunk must be a multiple of 8 sublanes"

    fused_tok = params["fused_tok"]      # (VOCAB_PAD, D_OUT)
    fused_lkg = params["fused_lkg"]      # (N_ENT_PAD, D_OUT)
    d_out = fused_tok.shape[1]

    tok_ids = input_ids.reshape(N, 1).astype(jnp.int32)
    ent_ids = entity_ids.reshape(N, 1).astype(jnp.int32)

    flops = 2 * N * d_out * (fused_tok.shape[0] + fused_lkg.shape[0])
    bytes_accessed = 4 * (tok_ids.size + ent_ids.size + fused_tok.size
                          + fused_lkg.size + N * d_out)

    out = pl.pallas_call(
        hybrid_embedding_kernel,
        out_shape=jax.ShapeDtypeStruct((N, d_out), jnp.float32),
        grid_spec=pltpu.PrefetchScalarGridSpec(
            num_scalar_prefetch=0,
            grid=(grid_blocks,),
            in_specs=[
                pl.BlockSpec((chunk, 1), lambda i: (i, 0)),          # token ids
                pl.BlockSpec((chunk, 1), lambda i: (i, 0)),          # entity ids
                pl.BlockSpec(fused_tok.shape, lambda i: (0, 0)),     # fused token table (resident)
                pl.BlockSpec(fused_lkg.shape, lambda i: (0, 0)),     # fused lkg table (resident)
            ],
            out_specs=pl.BlockSpec((chunk, d_out), lambda i: (i, 0)),
        ),
        compiler_params=pltpu.CompilerParams(
            dimension_semantics=("parallel",),
        ),
        cost_estimate=pl.CostEstimate(
            flops=flops, transcendentals=0, bytes_accessed=bytes_accessed),
    )(tok_ids, ent_ids, fused_tok, fused_lkg)

    return out.reshape(B, S, d_out)


def init_params(key):
    k_tok, k_lkg, k_w, k_b = jax.random.split(key, 4)
    wte_tok = jax.random.normal(k_tok, (VOCAB, D_TOK), jnp.float32)
    lkg_emb = jax.random.normal(k_lkg, (N_ENTITIES, D_LKG), jnp.float32)
    # PyTorch nn.Linear stores (out_features, in_features) and applies x @ W.T.
    w_pt = 0.02 * jax.random.normal(k_w, (D_OUT, D_TOK + D_LKG), jnp.float32)
    b_pt = 0.02 * jax.random.normal(k_b, (D_OUT,), jnp.float32)
    w_full = w_pt.T                                     # (D_TOK + D_LKG, D_OUT)

    # --- Offline fusion of the Linear (+ bias) into the tables -------------
    # cat(tok, lkg) @ W + b == tok @ W[:D_TOK] + lkg @ W[D_TOK:] + b
    # fused_tok carries the bias (each valid one-hot row sums to 1 exactly once).
    fused_tok = jnp.dot(wte_tok, w_full[:D_TOK, :],
                        precision=jax.lax.Precision.HIGHEST) + b_pt[None, :]
    fused_lkg = jnp.dot(lkg_emb, w_full[D_TOK:, :],
                        precision=jax.lax.Precision.HIGHEST)
    # Zero-pad contraction dims to tile-aligned widths (50->64, 20->32).
    fused_tok = jnp.pad(fused_tok, ((0, VOCAB_PAD - VOCAB), (0, 0)))
    fused_lkg = jnp.pad(fused_lkg, ((0, N_ENT_PAD - N_ENTITIES), (0, 0)))

    return {
        # raw parameters (reference path, keeps original-module semantics)
        "wte_tok": wte_tok,
        "lkg_emb": lkg_emb,
        "w_full": w_full,
        "b_lin": b_pt.reshape(1, D_OUT),
        # fused, padded tables consumed by the kernel
        "fused_tok": fused_tok,
        "fused_lkg": fused_lkg,
    }


def reference_forward(input_ids, entity_ids, params):
    tok = params["wte_tok"][input_ids]                 # (B,S,D_TOK)
    lkg = params["lkg_emb"][entity_ids]                # (B,S,D_LKG)
    comb = jnp.concatenate([tok, lkg], axis=-1)        # (B,S,D_TOK+D_LKG)
    return jnp.dot(comb, params["w_full"],
                   precision=jax.lax.Precision.HIGHEST) + params["b_lin"][0]


if __name__ == "__main__":
    key = jax.random.PRNGKey(0)
    k_ids, k_ent, k_p = jax.random.split(key, 3)

    input_ids = jax.random.randint(k_ids, (BATCH, SEQ_LEN), 0, VOCAB, dtype=jnp.int32)
    entity_ids = jax.random.randint(k_ent, (BATCH, SEQ_LEN), 0, N_ENTITIES, dtype=jnp.int32)
    params = init_params(k_p)

    out = hybrid_embedding_forward(input_ids, entity_ids, params)
    jax.block_until_ready(out)
    assert out.shape == (BATCH, SEQ_LEN, D_OUT)

    ref = reference_forward(input_ids, entity_ids, params)
    max_err = float(jnp.max(jnp.abs(out - ref)))
    assert jnp.allclose(out, ref, rtol=1e-3, atol=1e-3), f"max abs err {max_err}"

    print("KERNEL_OK")
</pallas_src>

<mosaic_0001>
module attributes {stable_mosaic.version = 11 : i64} {
  func.func @hybrid_embedding_kernel(%arg0: i32, %arg1: memref<16x1xi32, #tpu.memory_space<vmem>>, %arg2: memref<16x1xi32, #tpu.memory_space<vmem>>, %arg3: memref<64x64xf32, #tpu.memory_space<vmem>>, %arg4: memref<32x64xf32, #tpu.memory_space<vmem>>, %arg5: memref<16x64xf32, #tpu.memory_space<vmem>>) attributes {dimension_semantics = [#tpu.dimension_semantics<parallel>], iteration_bounds = array<i64: 1>, scalar_prefetch = 0 : i64, scratch_operands = 0 : i64, tpu.core_type = #tpu.core_type<tc>, window_params = [{transform_indices = @transform_0, window_bounds = array<i64: 16, 1>}, {transform_indices = @transform_1, window_bounds = array<i64: 16, 1>}, {pipeline_mode = #tpu.pipeline_mode<synchronous>, transform_indices = @transform_2, window_bounds = array<i64: 64, 64>}, {pipeline_mode = #tpu.pipeline_mode<synchronous>, transform_indices = @transform_3, window_bounds = array<i64: 32, 64>}, {transform_indices = @transform_4, window_bounds = array<i64: 16, 64>}]} {
    %c0 = arith.constant 0 : index
    %c0_0 = arith.constant 0 : index
    %0 = vector.load %arg1[%c0, %c0_0] : memref<16x1xi32, #tpu.memory_space<vmem>>, vector<16x1xi32>
    %c0_1 = arith.constant 0 : index
    %c0_2 = arith.constant 0 : index
    %1 = vector.load %arg2[%c0_1, %c0_2] : memref<16x1xi32, #tpu.memory_space<vmem>>, vector<16x1xi32>
    %2 = tpu.iota {dimensions = array<i32: 1>} : vector<16x64xi32>
    %3 = vector.broadcast %0 : vector<16x1xi32> to vector<16x64xi32>
    %4 = arith.cmpi eq, %2, %3 : vector<16x64xi32>
    %5 = arith.extui %4 : vector<16x64xi1> to vector<16x64xi32>
    %6 = arith.sitofp %5 : vector<16x64xi32> to vector<16x64xf32>
    %7 = tpu.iota {dimensions = array<i32: 1>} : vector<16x32xi32>
    %8 = vector.broadcast %1 : vector<16x1xi32> to vector<16x32xi32>
    %9 = arith.cmpi eq, %7, %8 : vector<16x32xi32>
    %10 = arith.extui %9 : vector<16x32xi1> to vector<16x32xi32>
    %11 = arith.sitofp %10 : vector<16x32xi32> to vector<16x32xf32>
    %c0_3 = arith.constant 0 : index
    %c0_4 = arith.constant 0 : index
    %12 = vector.load %arg3[%c0_3, %c0_4] : memref<64x64xf32, #tpu.memory_space<vmem>>, vector<64x64xf32>
    %cst = arith.constant dense<0.000000e+00> : vector<16x64xf32>
    %13 = tpu.matmul %6, %12, %cst {dimension_numbers = #tpu.dot_dimension_numbers<[1], [0], [0], [1], [0, 0, 1, 1], [], []>} : vector<16x64xf32>, vector<64x64xf32>, vector<16x64xf32> -> vector<16x64xf32>
    %c0_5 = arith.constant 0 : index
    %c0_6 = arith.constant 0 : index
    %14 = vector.load %arg4[%c0_5, %c0_6] : memref<32x64xf32, #tpu.memory_space<vmem>>, vector<32x64xf32>
    %cst_7 = arith.constant dense<0.000000e+00> : vector<16x64xf32>
    %15 = tpu.matmul %11, %14, %cst_7 {dimension_numbers = #tpu.dot_dimension_numbers<[1], [0], [0], [1], [0, 0, 1, 1], [], []>} : vector<16x32xf32>, vector<32x64xf32>, vector<16x64xf32> -> vector<16x64xf32>
    %16 = arith.addf %13, %15 : vector<16x64xf32>
    %c0_8 = arith.constant 0 : index
    %c0_9 = arith.constant 0 : index
    %17 = vector.load %arg5[%c0_8, %c0_9] : memref<16x64xf32, #tpu.memory_space<vmem>>, vector<16x64xf32>
    tpu.vector_store %arg5[%c0_8, %c0_9], %16 {strides = array<i32>} : memref<16x64xf32, #tpu.memory_space<vmem>>, vector<16x64xf32>,
    return
  }
  func.func @transform_0(%arg0: i32) -> (i32, i32) {
    %c0_i32 = arith.constant 0 : i32
    %c0_i32_0 = arith.constant 0 : i32
    return %arg0, %c0_i32 : i32, i32
  }
  func.func @transform_1(%arg0: i32) -> (i32, i32) {
    %c0_i32 = arith.constant 0 : i32
    %c0_i32_0 = arith.constant 0 : i32
    return %arg0, %c0_i32 : i32, i32
  }
  func.func @transform_2(%arg0: i32) -> (i32, i32) {
    %c0_i32 = arith.constant 0 : i32
    %c0_i32_0 = arith.constant 0 : i32
    %c0_i32_1 = arith.constant 0 : i32
    return %c0_i32, %c0_i32_0 : i32, i32
  }
  func.func @transform_3(%arg0: i32) -> (i32, i32) {
    %c0_i32 = arith.constant 0 : i32
    %c0_i32_0 = arith.constant 0 : i32
    %c0_i32_1 = arith.constant 0 : i32
    return %c0_i32, %c0_i32_0 : i32, i32
  }
  func.func @transform_4(%arg0: i32) -> (i32, i32) {
    %c0_i32 = arith.constant 0 : i32
    %c0_i32_0 = arith.constant 0 : i32
    return %arg0, %c0_i32 : i32, i32
  }
}

</mosaic_0001>

<bundles_post_ra>
// kernel: tpu_custom_call.1
= control target key start
LH: loop header
LB: loop body
LE: loop exit
PB: predicated region body
PF: predicated region fallthrough
CT: control target
= control target key end

     0   :  { %9 = vsyncpa [#allocation3], 0  ;;  %s308_s0 = inlined_call_operand.vmem [shape: s32[16,1], index: 0, kind: input, shape index: {}]   ;;  %s309_s1 = inlined_call_operand.vmem [shape: s32[16,1], index: 1, kind: input, shape index: {}]   ;;  %s310_s2 = inlined_call_operand.hbm [shape: f32[64,64], index: 2, kind: input, shape index: {}]   ;;  %s311_s3 = inlined_call_operand.vmem [shape: f32[32,64], index: 3, kind: input, shape index: {}]   ;;  %s312_s4 = inlined_call_operand.hbm [shape: f32[16,64], index: 4, kind: output, shape index: {}]  }
   0x1   :  { %10 = vsyncpa [#allocation4], 0  ;;  %s19_s17 = sshll.u32 %s310_s2, 4  ;;  %s237_s18 = smov [#allocation2]   ;;  %s20_s17 = int_to_ptr.hbm [resolvable:$true] %s19_s17 }
   0x2   :  { %s21_s19 = sshll.u32 %s237_s18, 4  ;;  %s238_s20 = smov 128   ;;  %s22_s19 = int_to_ptr.vmem [resolvable:$true] %s21_s19 }
   0x3   :  { %s239_s21 = smov 8  }
   0x4   :  { %27 = dma.hbm_to_vmem [thread:$0]  %s20_s17, 1024, %s22_s19, [#allocation3], %s238_s20, %s238_s20, %s239_s21  }
   0x5   :  { %233 = dma.done.wait [#allocation3], 1024  }
   0x6   :  { %234 = vsyncadd [#allocation3], 4294966272  ;;  %v240_v0 = vmov 0   ;;  %v35_v1 = vld [vmem:[%s308_s0 + $0x8] sm:$0xff]  ;;  %v34_v2 = vld [vmem:[%s308_s0] sm:$0xff]  ;;  %v38_v17 = vlaneseq  ;;  %vm106_vm0 = vcmask 523264  }
   0x7   :  { %184 = vset.pattern.permute.xlu1 %v240_v0  ;;  %183 = vset.pattern.permute.xlu0 %v240_v0  ;;  %v71_v3 = vld [vmem:[#allocation2 + $0x38] sm:$0xff]  ;;  %v70_v4 = vld [vmem:[#allocation2 + $0x30] sm:$0xff]  ;;  %v69_v5 = vld [vmem:[#allocation2 + $0x28] sm:$0xff]  ;;  %v241_v21 = vmov 0.0   ;;  %vm76_vm3 = vcmask 261120   ;;  %s144_s12 = sshll.u32 %s312_s4, 4  ;;  %s145_s12 = int_to_ptr.hbm [resolvable:$true] %s144_s12 }
   0x8   :  { %44 = vperm.xlu0 %183, %v35_v1   ;;  %41 = vperm.xlu1 %184, %v34_v2   ;;  %v68_v6 = vld [vmem:[#allocation2 + $0x20] sm:$0xff]  ;;  %v37_v7 = vld [vmem:[%s309_s1 + $0x8] sm:$0xff]  ;;  %v67_v9 = vld [vmem:[#allocation2 + $0x18] sm:$0xff]  ;;  %v39_v18 = vand.u32 127, %v38_v17 }
   0x9   :  { %169 = vmatpush.msra.mxu2 %v71_v3  ;;  %121 = vmatpush.msra.mxu1 %v71_v3  ;;  %v36_v8 = vld [vmem:[%s309_s1] sm:$0xff]  ;;  %v66_v10 = vld [vmem:[#allocation2 + $0x10] sm:$0xff]  ;;  %v65_v11 = vld [vmem:[#allocation2 + $0x8] sm:$0xff] }
   0xa   :  { %v64_v12 = vld [vmem:[#allocation2] sm:$0xff]  ;;  %v75_v13 = vld [vmem:[%s311_s3 + $0x18] sm:$0xff]  ;;  %v74_v14 = vld [vmem:[%s311_s3 + $0x10] sm:$0xff] }
   0xb   :  { %170 = vmatpush.msra.mxu2 %v70_v4  ;;  %122 = vmatpush.msra.mxu1 %v70_v4  ;;  %v73_v15 = vld [vmem:[%s311_s3 + $0x8] sm:$0xff]  ;;  %v72_v16 = vld [vmem:[%s311_s3] sm:$0xff]  ;;  %s242_s3 = smov [#allocation5]  }
   0xc   :  { %95 = vmatpush.msra.mxu0 %v75_v13  ;;  %165 = vmatpush.msra.mxu3 %v75_v13  ;;  %s142_s9 = sshll.u32 %s242_s3, 4  ;;  %s143_s9 = int_to_ptr.vmem [resolvable:$true] %s142_s9 }
   0xd   :  { %171 = vmatpush.msra.mxu2 %v69_v5  ;;  %123 = vmatpush.msra.mxu1 %v69_v5 }
   0xe   :  { %96 = vmatpush.msra.mxu0 %v74_v14  ;;  %166 = vmatpush.msra.mxu3 %v74_v14 }
   0xf   :  { %172 = vmatpush.msra.mxu2 %v68_v6  ;;  %124 = vmatpush.msra.mxu1 %v68_v6 }
  0x10   :  { %56 = vperm.xlu0 %183, %v37_v7   ;;  %53 = vperm.xlu1 %184, %v36_v8  }
  0x11   :  { %173 = vmatpush.msra.mxu2 %v67_v9  ;;  %125 = vmatpush.msra.mxu1 %v67_v9 }
  0x12   :  { %97 = vmatpush.msra.mxu0 %v73_v15  ;;  %167 = vmatpush.msra.mxu3 %v73_v15 }
  0x13   :  { %174 = vmatpush.msra.mxu2 %v66_v10  ;;  %126 = vmatpush.msra.mxu1 %v66_v10 }
  0x14   :  { %98 = vmatpush.msra.mxu0 %v72_v16  ;;  %168 = vmatpush.msra.mxu3 %v72_v16 }
  0x15   :  { %175 = vmatpush.msra.mxu2 %v65_v11  ;;  %127 = vmatpush.msra.mxu1 %v65_v11 }
  0x17   :  { %176 = vmatpush.msra.mxu2 %v64_v12  ;;  %128 = vmatpush.msra.mxu1 %v64_v12 }
  0x7a   :  { %v45_v19 = vpop.permute.xlu0 %44  ;;  %v42_v20 = vpop.permute.xlu1 %41 }
  0x7b   :  { %vm47_vm1 = vcmp.eq.s32.totalorder %v39_v18, %v45_v19  ;;  %vm46_vm2 = vcmp.eq.s32.totalorder %v39_v18, %v42_v20 }
  0x7c   :  { %v158_v22 = vsel %vm47_vm1, 1.0, %v241_v21  ;;  %v157_v23 = vsel %vm46_vm2, 1.0, %v241_v21 }
  0x7d   :  { %164 = vmatmul.msk.f32.vlgmr.msra.gmra.mxu2 %vm106_vm0, %v158_v22  ;;  %163 = vmatmul.msk.f32.vlgmr.msra.gmra.mxu1 %vm106_vm0, %v157_v23 }
  0x82   :  { %v57_v24 = vpop.permute.xlu0 %56  ;;  %v54_v25 = vpop.permute.xlu1 %53 }
  0x83   :  { %vm59_vm4 = vcmp.eq.s32.totalorder %v39_v18, %v57_v24  ;;  %vm58_vm5 = vcmp.eq.s32.totalorder %v39_v18, %v54_v25 }
  0x84   :  { %v160_v26 = vsel %vm59_vm4, 1.0, %v241_v21  ;;  %v159_v27 = vsel %vm58_vm5, 1.0, %v241_v21 }
  0x85   :  { %161 = vmatmul.msk.f32.vlgmr.msra.gmra.mxu0 %vm76_vm3, %v159_v27  ;;  %162 = vmatmul.msk.f32.vlgmr.msra.gmra.mxu3 %vm76_vm3, %v160_v26 }
  0xfa   :  { %v130_v28 = vpop.f32.mrf.mxu1 }
 0x100   :  { %v133_v31 = vpop.f32.mrf.mxu2 }
 0x102   :  { %v100_v29 = vpop.f32.mrf.mxu0 }
 0x103   :  { %v131_v30 = vadd.f32 %v130_v28, %v100_v29 }
 0x105   :  { %136 = vst.msk [vmem:[#allocation5] sm:$0xff] %vm106_vm0, %v131_v30 }
 0x108   :  { %v103_v32 = vpop.f32.mrf.mxu3 }
 0x109   :  { %v134_v33 = vadd.f32 %v133_v31, %v103_v32 }
 0x10b   :  { %137 = vst.msk [vmem:[#allocation5 + $0x8] sm:$0xff] %vm106_vm0, %v134_v33 }
 0x10c   :  { %150 = dma.vmem_to_hbm [thread:$0]  %s143_s9, 256, %s145_s12, [#allocation4], %s238_s20, %s238_s20, %s239_s21  }
 0x10d   :  { %235 = dma.done.wait [#allocation4], 256  }
 0x10e   :  { %236 = vsyncadd [#allocation4], 4294967040 }
 0x10f   :  { %155 = vsyncpa [#allocation3], 1 }
 0x110   :  { %156 = vsyncpa [#allocation4], 1 }

</bundles_post_ra>
